<compile_context>
chip_gen: v7x
topology: tpu7x:2x2x1
jax: 0.10.0
libtpu: 0.0.40
codegen_flags: <defaults>
</compile_context>

<pallas_src>
import functools
from math import sqrt

import jax
import jax.numpy as jnp
from jax.experimental import pallas as pl
from jax.experimental.pallas import tpu as pltpu


# ------------------------------ Pallas kernel ------------------------------
def _full_attention_kernel(q_ref, k_ref, v_ref, out_ref, attn_ref, *, scale):
    # q_ref: (G, L, E), k_ref: (G, S, E), v_ref: (G, S, Dv)  with G = B*H
    q = q_ref[...]
    k = k_ref[...]
    v = v_ref[...]

    # scores[g, l, s] = sum_e q[g, l, e] * k[g, s, e]   (no transpose of K)
    scores = jnp.einsum("gle,gse->gls", q, k,
                        preferred_element_type=jnp.float32) * scale

    # numerically stable softmax over s
    m = jnp.max(scores, axis=-1, keepdims=True)
    p = jnp.exp(scores - m)
    a = p * pl.reciprocal(jnp.sum(p, axis=-1, keepdims=True), approx=True)

    attn_ref[...] = a.astype(attn_ref.dtype)

    # out[g, l, d] = sum_s a[g, l, s] * v[g, s, d]
    out = jnp.einsum("gls,gsd->gld", a, v,
                     preferred_element_type=jnp.float32)
    out_ref[...] = out.astype(out_ref.dtype)


# -------------------------------- wrapper -----------------------------------
def full_attention(queries, keys, values):
    """queries: (B, L, H, E), keys: (B, S, H, E), values: (B, S, H, Dv).
    Returns (V: (B, L, H, Dv), A: (B, H, L, S)) — matching FullAttention.forward."""
    B, L, H, E = queries.shape
    _, S, _, Dv = values.shape
    G = B * H
    scale = 1.0 / sqrt(E)

    # Head-major layout plumbing outside the kernel (layout only, no compute).
    q = jnp.transpose(queries, (0, 2, 1, 3)).reshape(G, L, E)
    k = jnp.transpose(keys, (0, 2, 1, 3)).reshape(G, S, E)
    v = jnp.transpose(values, (0, 2, 1, 3)).reshape(G, S, Dv)

    vmem = pl.BlockSpec(memory_space=pltpu.MemorySpace.VMEM)
    out, attn = pl.pallas_call(
        functools.partial(_full_attention_kernel, scale=scale),
        out_shape=(
            jax.ShapeDtypeStruct((G, L, Dv), queries.dtype),
            jax.ShapeDtypeStruct((G, L, S), jnp.float32),
        ),
        in_specs=[vmem, vmem, vmem],
        out_specs=(vmem, vmem),
    )(q, k, v)

    V = jnp.transpose(out.reshape(B, H, L, Dv), (0, 2, 1, 3))  # (B, L, H, Dv)
    A = attn.reshape(B, H, L, S)                               # (B, H, L, S)
    return V, A


# -------------------------- pure-JAX reference -------------------------------
def ref_full_attention(queries, keys, values):
    E = queries.shape[-1]
    scale = 1.0 / sqrt(E)
    scores = jnp.einsum("blhe,bshe->bhls", queries, keys)
    A = jax.nn.softmax(scale * scores, axis=-1)
    V = jnp.einsum("bhls,bshd->blhd", A, values)
    return V, A


# ---------------------------------- main -------------------------------------
if __name__ == "__main__":
    B, L, S, H, E, Dv = 2, 8, 12, 2, 16, 16

    key = jax.random.PRNGKey(0)
    kq, kk, kv = jax.random.split(key, 3)
    queries = jax.random.normal(kq, (B, L, H, E), jnp.float32)
    keys = jax.random.normal(kk, (B, S, H, E), jnp.float32)
    values = jax.random.normal(kv, (B, S, H, Dv), jnp.float32)

    V, A = full_attention(queries, keys, values)
    V = jax.block_until_ready(V)
    A = jax.block_until_ready(A)

    V_ref, A_ref = ref_full_attention(queries, keys, values)
    # Tolerance slightly loosened because the softmax denominator uses the
    # EUP approximate reciprocal (pl.reciprocal(approx=True)).
    assert V.shape == (B, L, H, Dv) and A.shape == (B, H, L, S)
    assert jnp.allclose(V, V_ref, rtol=5e-3, atol=5e-3), "V mismatch"
    assert jnp.allclose(A, A_ref, rtol=5e-3, atol=5e-3), "A mismatch"

    print("KERNEL_OK")
</pallas_src>

<mosaic_0001>
module attributes {stable_mosaic.version = 11 : i64} {
  func.func @_full_attention_kernel(%arg0: memref<4x8x16xf32, #tpu.memory_space<vmem>>, %arg1: memref<4x12x16xf32, #tpu.memory_space<vmem>>, %arg2: memref<4x12x16xf32, #tpu.memory_space<vmem>>, %arg3: memref<4x8x16xf32, #tpu.memory_space<vmem>>, %arg4: memref<4x8x12xf32, #tpu.memory_space<vmem>>) attributes {dimension_semantics = [], scalar_prefetch = 0 : i64, scratch_operands = 0 : i64, tpu.core_type = #tpu.core_type<tc>} {
    %c0 = arith.constant 0 : index
    %c0_0 = arith.constant 0 : index
    %c0_1 = arith.constant 0 : index
    %0 = vector.load %arg0[%c0, %c0_0, %c0_1] : memref<4x8x16xf32, #tpu.memory_space<vmem>>, vector<4x8x16xf32>
    %c0_2 = arith.constant 0 : index
    %c0_3 = arith.constant 0 : index
    %c0_4 = arith.constant 0 : index
    %1 = vector.load %arg1[%c0_2, %c0_3, %c0_4] : memref<4x12x16xf32, #tpu.memory_space<vmem>>, vector<4x12x16xf32>
    %c0_5 = arith.constant 0 : index
    %c0_6 = arith.constant 0 : index
    %c0_7 = arith.constant 0 : index
    %2 = vector.load %arg2[%c0_5, %c0_6, %c0_7] : memref<4x12x16xf32, #tpu.memory_space<vmem>>, vector<4x12x16xf32>
    "tpu.trace_start"() <{level = 10 : i32, message = "gle,gse->gls"}> : () -> ()
    %cst = arith.constant dense<0.000000e+00> : vector<4x8x12xf32>
    %3 = tpu.matmul %0, %1, %cst {dimension_numbers = #tpu.dot_dimension_numbers<[2], [2], [1], [1], [0, 0, 0, 1, 1, 1], [0], [0]>} : vector<4x8x16xf32>, vector<4x12x16xf32>, vector<4x8x12xf32> -> vector<4x8x12xf32>
    "tpu.trace_stop"() : () -> ()
    %cst_8 = arith.constant 2.500000e-01 : f32
    %4 = vector.broadcast %cst_8 : f32 to vector<4x8x12xf32>
    %5 = arith.mulf %3, %4 : vector<4x8x12xf32>
    %cst_9 = arith.constant dense<0xFF800000> : vector<4x8xf32>
    %6 = vector.multi_reduction <maximumf>, %5, %cst_9 [2] : vector<4x8x12xf32> to vector<4x8xf32>
    %7 = vector.shape_cast %6 : vector<4x8xf32> to vector<4x8x1xf32>
    %8 = vector.broadcast %7 : vector<4x8x1xf32> to vector<4x8x12xf32>
    %9 = arith.subf %5, %8 : vector<4x8x12xf32>
    %10 = math.exp %9 : vector<4x8x12xf32>
    %cst_10 = arith.constant dense<0.000000e+00> : vector<4x8xf32>
    %11 = vector.multi_reduction <add>, %10, %cst_10 [2] : vector<4x8x12xf32> to vector<4x8xf32>
    %12 = vector.shape_cast %11 : vector<4x8xf32> to vector<4x8x1xf32>
    %13 = tpu.reciprocal %12 {approx = true} : vector<4x8x1xf32> -> vector<4x8x1xf32>
    %14 = vector.broadcast %13 : vector<4x8x1xf32> to vector<4x8x12xf32>
    %15 = arith.mulf %10, %14 : vector<4x8x12xf32>
    %c0_11 = arith.constant 0 : index
    %c0_12 = arith.constant 0 : index
    %c0_13 = arith.constant 0 : index
    %16 = vector.load %arg4[%c0_11, %c0_12, %c0_13] : memref<4x8x12xf32, #tpu.memory_space<vmem>>, vector<4x8x12xf32>
    tpu.vector_store %arg4[%c0_11, %c0_12, %c0_13], %15 {strides = array<i32>} : memref<4x8x12xf32, #tpu.memory_space<vmem>>, vector<4x8x12xf32>,
    "tpu.trace_start"() <{level = 10 : i32, message = "gls,gsd->gld"}> : () -> ()
    %cst_14 = arith.constant dense<0.000000e+00> : vector<4x8x16xf32>
    %17 = tpu.matmul %15, %2, %cst_14 {dimension_numbers = #tpu.dot_dimension_numbers<[2], [1], [1], [2], [0, 0, 0, 1, 1, 2], [0], [0]>} : vector<4x8x12xf32>, vector<4x12x16xf32>, vector<4x8x16xf32> -> vector<4x8x16xf32>
    "tpu.trace_stop"() : () -> ()
    %c0_15 = arith.constant 0 : index
    %c0_16 = arith.constant 0 : index
    %c0_17 = arith.constant 0 : index
    %18 = vector.load %arg3[%c0_15, %c0_16, %c0_17] : memref<4x8x16xf32, #tpu.memory_space<vmem>>, vector<4x8x16xf32>
    tpu.vector_store %arg3[%c0_15, %c0_16, %c0_17], %17 {strides = array<i32>} : memref<4x8x16xf32, #tpu.memory_space<vmem>>, vector<4x8x16xf32>,
    return
  }
}

</mosaic_0001>

<bundles_post_ra>
// kernel: tpu_custom_call.1
= control target key start
LH: loop header
LB: loop body
LE: loop exit
PB: predicated region body
PF: predicated region fallthrough
CT: control target
= control target key end

     0   :  { %10 = vsyncpa [#allocation3], 0  ;;  %vm38_vm0 = vcmask 130048   ;;  %v953_v3 = vmov 0.0|0.0   ;;  %vm954_vm2 = vmmov 0   ;;  %v955_v8 = vmov 0.0   ;;  %s1150_s0 = inlined_call_operand.vmem [shape: f32[4,8,16], index: 0, kind: input, shape index: {}]   ;;  %s1151_s1 = inlined_call_operand.vmem [shape: f32[4,12,16], index: 1, kind: input, shape index: {}]   ;;  %s1152_s2 = inlined_call_operand.vmem [shape: f32[4,12,16], index: 2, kind: input, shape index: {}]   ;;  %s1153_s3 = inlined_call_operand.hbm [shape: f32[4,8,16], index: 3, kind: output, shape index: {0}]   ;;  %s1154_s4 = inlined_call_operand.hbm [shape: f32[4,8,12], index: 4, kind: output, shape index: {1}]  }
   0x1   :  { %v22_v0 = vld [vmem:[%s1151_s1] sm:$0xff]  ;;  %v23_v1 = vld [vmem:[%s1151_s1 + $0x8] sm:$0xf]  ;;  %v24_v2 = vld [vmem:[%s1151_s1 + $0x10] sm:$0xff]  ;;  %849 = vmatprep.subr.bf16.mxu0 %v953_v3  ;;  %853 = vmatprep.subr.bf16.mxu1 %v953_v3 }
   0x2   :  { %v850_v4 = vpack.c.bf16 %v23_v1, %v22_v0  ;;  %vm998_vm1 = vmpackc.low %vm38_vm0, %vm38_vm0  ;;  %v25_v6 = vld [vmem:[%s1151_s1 + $0x18] sm:$0xf]  ;;  %797 = vmatprep.mubr.msk.f32.mxu0 %vm954_vm2, %v955_v8  ;;  %804 = vmatprep.mubr.msk.f32.mxu1 %vm954_vm2, %v955_v8  ;;  %v26_v9 = vld [vmem:[%s1151_s1 + $0x20] sm:$0xff] }
   0x3   :  { %v854_v7 = vpack.c.bf16 %v25_v6, %v24_v2  ;;  %v27_v10 = vld [vmem:[%s1151_s1 + $0x28] sm:$0xf] }
   0x4   :  { %852 = vmatpush3.bf16.xpose.msk.msra.mxu0 %vm998_vm1, %v850_v4 }
   0x5   :  { %856 = vmatpush3.bf16.xpose.msk.msra.mxu1 %vm998_vm1, %v854_v7  ;;  %857 = vmatprep.subr.bf16.mxu0 %v953_v3 }
   0x6   :  { %11 = vsyncpa [#allocation5], 0  ;;  %861 = vmatprep.subr.bf16.mxu1 %v953_v3  ;;  %v28_v11 = vld [vmem:[%s1151_s1 + $0x30] sm:$0xff]  ;;  %v29_v12 = vld [vmem:[%s1151_s1 + $0x38] sm:$0xf]  ;;  %v858_v14 = vpack.c.bf16 %v27_v10, %v26_v9  ;;  %vm359_vm3 = vcmask 97280  }
   0x7   :  { %v18_v13 = vld [vmem:[%s1150_s0] sm:$0xff]  ;;  %v19_v15 = vld [vmem:[%s1150_s0 + $0x8] sm:$0xff]  ;;  %v862_v16 = vpack.c.bf16 %v29_v12, %v28_v11  ;;  %v20_v17 = vld [vmem:[%s1150_s0 + $0x10] sm:$0xff]  ;;  %vm411_vm4 = vcmask 1043456   ;;  %vm956_vm5 = vmmov 1  }
   0x8   :  { %v21_v18 = vld [vmem:[%s1150_s0 + $0x18] sm:$0xff]  ;;  %v30_v55 = vld [vmem:[%s1152_s2] sm:$0xff]  ;;  %v31_v56 = vld [vmem:[%s1152_s2 + $0x8] sm:$0xf] }
   0x9   :  { %v866_v57 = vpack.c.bf16 %v31_v56, %v30_v55  ;;  %vm1072_vm6 = vmpackc.low %vm411_vm4, %vm956_vm5  ;;  %v32_v59 = vld [vmem:[%s1152_s2 + $0x10] sm:$0xff]  ;;  %v33_v60 = vld [vmem:[%s1152_s2 + $0x18] sm:$0xf] }
   0xa   :  { %v870_v61 = vpack.c.bf16 %v33_v60, %v32_v59  ;;  %v34_v1 = vld [vmem:[%s1152_s2 + $0x20] sm:$0xff]  ;;  %v35_v2 = vld [vmem:[%s1152_s2 + $0x28] sm:$0xf]  ;;  %v37_v9 = vld [vmem:[%s1152_s2 + $0x38] sm:$0xf] }
   0xb   :  { %798 = vmatmul.mubr.msk.f32.vlgmr.msra.gmra.mrb[0].mxu0 %vm38_vm0, %v18_v13  ;;  %v874_v5 = vpack.c.bf16 %v35_v2, %v34_v1 }
   0xc   :  { %860 = vmatpush3.bf16.xpose.msk.msra.mxu0 %vm998_vm1, %v858_v14  ;;  %805 = vmatmul.mubr.msk.f32.vlgmr.msra.gmra.mrb[0].mxu1 %vm38_vm0, %v19_v15 }
   0xd   :  { %864 = vmatpush3.bf16.xpose.msk.msra.mxu1 %vm998_vm1, %v862_v16  ;;  %811 = vmatprep.mubr.msk.f32.mxu0 %vm954_vm2, %v955_v8 }
   0xe   :  { %818 = vmatprep.mubr.msk.f32.mxu1 %vm954_vm2, %v955_v8  ;;  %865 = vmatprep.subr.bf16.mxu0 %v953_v3 }
   0xf   :  { %869 = vmatprep.subr.bf16.mxu1 %v953_v3 }
  0x13   :  { %812 = vmatmul.mubr.msk.f32.vlgmr.msra.gmra.mrb[2].mxu0 %vm38_vm0, %v20_v17 }
  0x14   :  { %819 = vmatmul.mubr.msk.f32.vlgmr.msra.gmra.mrb[2].mxu1 %vm38_vm0, %v21_v18  ;;  %825 = vmatprep.mubr.msk.f32.mxu0 %vm954_vm2, %v955_v8 }
  0x15   :  { %832 = vmatprep.mubr.msk.f32.mxu1 %vm954_vm2, %v955_v8  ;;  %868 = vmatpush3.bf16.msk.msra.mxu0 %vm1072_vm6, %v866_v57 }
  0x16   :  { %873 = vmatprep.subr.bf16.mxu0 %v953_v3  ;;  %872 = vmatpush3.bf16.msk.msra.mxu1 %vm1072_vm6, %v870_v61 }
  0x17   :  { %877 = vmatprep.subr.bf16.mxu1 %v953_v3  ;;  %v36_v3 = vld [vmem:[%s1152_s2 + $0x30] sm:$0xff]  ;;  %s957_s2 = smov [#allocation4]  }
  0x18   :  { %v878_v11 = vpack.c.bf16 %v37_v9, %v36_v3  ;;  %s734_s27 = sshll.u32 %s957_s2, 4  ;;  %s735_s27 = int_to_ptr.vmem [resolvable:$true] %s734_s27 }
  0x19   :  { %s905_s28 = scalar_lea.vmem %s735_s27, 512  ;;  %p910_p1 = scmp.lt.s32.totalorder %s735_s27, %s735_s27 }
  0x1a   :  { %p906_p0 = scmp.ne.s32.totalorder %s735_s27, %s905_s28  ;;  %p911_p2 = scmp.lt.s32.totalorder %s905_s28, %s905_s28 }
  0x1c   :  { %p912_p3 = por %p911_p2, %p910_p1 }
  0x1e   :  { %p913_p4 = pnand %p912_p3, %p906_p0 }
  0xde   :  { %v114_v19 = vpop.f32.mrb[0].mxu0 }
  0xdf   :  { %v355_v20 = vmul.f32 0.25, %v114_v19  ;;  %v799_v21 = vpop.f32.mrb[1].mxu0  ;;  %v193_v22 = vpop.f32.mrb[0].mxu1 }
  0xe0   :  { %v356_v23 = vmul.f32 0.25, %v193_v22  ;;  %v806_v24 = vpop.f32.mrb[1].mxu1 }
  0xe1   :  { %v360_v25 = vsel %vm359_vm3, %v355_v20, -inf }
  0xe2   :  { %361 = vmax.xlane.f32.xlu0 %v360_v25  ;;  %v363_v26 = vsel %vm359_vm3, %v356_v23, -inf }
  0xe6   :  { %364 = vmax.xlane.f32.xlu0 %v363_v26  ;;  %v272_v27 = vpop.f32.mrb[2].mxu0 }
  0xe7   :  { %v357_v28 = vmul.f32 0.25, %v272_v27  ;;  %v813_v29 = vpop.f32.mrb[3].mxu0  ;;  %v351_v30 = vpop.f32.mrb[2].mxu1 }
  0xe8   :  { %v358_v31 = vmul.f32 0.25, %v351_v30  ;;  %v820_v32 = vpop.f32.mrb[3].mxu1 }
  0xe9   :  { %v366_v33 = vsel %vm359_vm3, %v357_v28, -inf }
  0xea   :  { %367 = vmax.xlane.f32.xlu1 %v366_v33  ;;  %v369_v34 = vsel %vm359_vm3, %v358_v31, -inf }
  0xee   :  { %370 = vmax.xlane.f32.xlu1 %v369_v34 }
 0x16f   :  { %v362_v35 = vpop.xlane.xlu0 %361 }
 0x170   :  { %v372_v36 = vsub.f32 %v355_v20, %v362_v35 }
 0x172   :  { %v376_v37 = vmul.f32 1.442695, %v372_v36 }
 0x173   :  { %v365_v38 = vpop.xlane.xlu0 %364 }
 0x174   :  { %889 = vpow2.f32 %v376_v37  ;;  %v373_v39 = vsub.f32 %v356_v23, %v365_v38 }
 0x176   :  { %v378_v40 = vmul.f32 1.442695, %v373_v39 }
 0x177   :  { %v368_v41 = vpop.xlane.xlu1 %367 }
 0x178   :  { %891 = vpow2.f32 %v378_v40  ;;  %v374_v42 = vsub.f32 %v357_v28, %v368_v41 }
 0x17a   :  { %v380_v43 = vmul.f32 1.442695, %v374_v42 }
 0x17b   :  { %v371_v44 = vpop.xlane.xlu1 %370 }
 0x17c   :  { %893 = vpow2.f32 %v380_v43  ;;  %v375_v45 = vsub.f32 %v358_v31, %v371_v44 }
 0x17e   :  { %v890_v46 = vpop.eup %889  ;;  %v382_v47 = vmul.f32 1.442695, %v375_v45 }
 0x17f   :  { %v384_v48 = vsel %vm359_vm3, %v890_v46, 0.0 }
 0x180   :  { %895 = vpow2.f32 %v382_v47  ;;  %385 = vadd.xlane.f32.xlu0 %v384_v48 }
 0x182   :  { %v892_v49 = vpop.eup %891 }
 0x183   :  { %v387_v50 = vsel %vm359_vm3, %v892_v49, 0.0 }
 0x184   :  { %388 = vadd.xlane.f32.xlu1 %v387_v50 }
 0x186   :  { %v894_v51 = vpop.eup %893 }
 0x187   :  { %v390_v52 = vsel %vm359_vm3, %v894_v51, 0.0 }
 0x188   :  { %391 = vadd.xlane.f32.xlu0 %v390_v52 }
 0x18a   :  { %v896_v53 = vpop.eup %895 }
 0x18b   :  { %v393_v54 = vsel %vm359_vm3, %v896_v53, 0.0 }
 0x18c   :  { %394 = vadd.xlane.f32.xlu1 %v393_v54 }
 0x20d   :  { %v386_v62 = vpop.xlane.xlu0 %385 }
 0x20e   :  { %897 = vrcp.f32 %v386_v62 }
 0x211   :  { %v389_v63 = vpop.xlane.xlu1 %388 }
 0x212   :  { %899 = vrcp.f32 %v389_v63 }
 0x215   :  { %v392_v0 = vpop.xlane.xlu0 %391 }
 0x216   :  { %901 = vrcp.f32 %v392_v0 }
 0x218   :  { %v898_v4 = vpop.eup %897 }
 0x219   :  { %v400_v6 = vmul.f32 %v898_v4, %v890_v46  ;;  %v395_v7 = vpop.xlane.xlu1 %394 }
 0x21a   :  { %903 = vrcp.f32 %v395_v7 }
 0x21b   :  { %404 = vst.msk [vmem:[#allocation4] sm:$0xff] %vm359_vm3, %v400_v6  ;;  %826 = vmatmul.mubr.msk.f32.vlgmr.msra.gmra.mrb[4].mxu0 %vm359_vm3, %v400_v6 }
 0x21c   :  { %v900_v10 = vpop.eup %899  ;;  %876 = vmatpush3.bf16.msk.msra.mxu0 %vm1072_vm6, %v874_v5  ;;  %839 = vmatprep.mubr.msk.f32.mxu0 %vm954_vm2, %v955_v8 }
 0x21d   :  { %v401_v12 = vmul.f32 %v900_v10, %v892_v49 }
 0x21f   :  { %405 = vst.msk [vmem:[#allocation4 + $0x8] sm:$0xff] %vm359_vm3, %v401_v12  ;;  %833 = vmatmul.mubr.msk.f32.vlgmr.msra.gmra.mrb[4].mxu1 %vm359_vm3, %v401_v12 }
 0x220   :  { %v902_v13 = vpop.eup %901  ;;  %880 = vmatpush3.bf16.msk.msra.mxu1 %vm1072_vm6, %v878_v11  ;;  %846 = vmatprep.mubr.msk.f32.mxu1 %vm954_vm2, %v955_v8 }
 0x221   :  { %v402_v14 = vmul.f32 %v902_v13, %v894_v51 }
 0x223   :  { %406 = vst.msk [vmem:[#allocation4 + $0x10] sm:$0xff] %vm359_vm3, %v402_v14  ;;  %840 = vmatmul.mubr.msk.f32.vlgmr.msra.gmra.mrb[6].mxu0 %vm359_vm3, %v402_v14 }
 0x224   :  { %v904_v15 = vpop.eup %903 }
 0x225   :  { %v403_v16 = vmul.f32 %v904_v15, %v896_v53 }
 0x227   :  { %407 = vst.msk [vmem:[#allocation4 + $0x18] sm:$0xff] %vm359_vm3, %v403_v16  ;;  %847 = vmatmul.mubr.msk.f32.vlgmr.msra.gmra.mrb[6].mxu1 %vm359_vm3, %v403_v16 }
 0x228   :  { %916 = shalt.err (!%p913_p4)
}
 0x229   :  { %s917_s5 = scalar_lea.hbm %s1154_s4, 512 }
 0x22a   :  { %p918_p5 = scmp.ne.s32.totalorder %s1154_s4, %s917_s5  ;;  %p921_p6 = scmp.lt.u32.totalorder %s917_s5, %s1154_s4 }
 0x22c   :  { %p923_p7 = pnand %p921_p6, %p918_p5 }
 0x22e   :  { %926 = shalt.err (!%p923_p7)
}
 0x22f   :  { %s958_s9 = smov 128   ;;  %s959_s10 = smov 8  }
 0x230   :  { %740 = dma.vmem_to_hbm [thread:$0]  %s735_s27, 512, %s1154_s4, [#allocation5], %s958_s9, %s958_s9, %s959_s10  }
 0x231   :  { %s960_s12 = smov [#allocation2]  }
 0x232   :  { %s722_s13 = sshll.u32 %s960_s12, 4  ;;  %s723_s13 = int_to_ptr.vmem [resolvable:$true] %s722_s13 }
 0x233   :  { %s927_s4 = scalar_lea.vmem %s723_s13, 512  ;;  %p932_p9 = scmp.lt.s32.totalorder %s723_s13, %s723_s13 }
 0x234   :  { %p928_p8 = scmp.ne.s32.totalorder %s723_s13, %s927_s4  ;;  %p933_p10 = scmp.lt.s32.totalorder %s927_s4, %s927_s4 }
 0x236   :  { %p934_p11 = por %p933_p10, %p932_p9 }
 0x238   :  { %p935_p12 = pnand %p934_p11, %p928_p8 }
 0x2ee   :  { %v481_v8 = vpop.f32.mrb[4].mxu0 }
 0x2ef   :  { %713 = vst.msk [vmem:[#allocation2] sm:$0xff] %vm38_vm0, %v481_v8  ;;  %v827_v17 = vpop.f32.mrb[5].mxu0 }
 0x2f2   :  { %v557_v18 = vpop.f32.mrb[4].mxu1 }
 0x2f3   :  { %714 = vst.msk [vmem:[#allocation2 + $0x8] sm:$0xff] %vm38_vm0, %v557_v18  ;;  %v834_v19 = vpop.f32.mrb[5].mxu1 }
 0x2f6   :  { %v633_v20 = vpop.f32.mrb[6].mxu0 }
 0x2f7   :  { %715 = vst.msk [vmem:[#allocation2 + $0x10] sm:$0xff] %vm38_vm0, %v633_v20  ;;  %v841_v21 = vpop.f32.mrb[7].mxu0 }
 0x2fa   :  { %v709_v22 = vpop.f32.mrb[6].mxu1 }
 0x2fb   :  { %716 = vst.msk [vmem:[#allocation2 + $0x18] sm:$0xff] %vm38_vm0, %v709_v22  ;;  %v848_v23 = vpop.f32.mrb[7].mxu1 }
 0x2fc   :  { %938 = shalt.err (!%p935_p12)
}
 0x2fd   :  { %s939_s16 = scalar_lea.hbm %s1153_s3, 512 }
 0x2fe   :  { %p940_p13 = scmp.ne.s32.totalorder %s1153_s3, %s939_s16  ;;  %p943_p0 = scmp.lt.u32.totalorder %s939_s16, %s1153_s3 }
 0x300   :  { %p945_p1 = pnand %p943_p0, %p940_p13 }
 0x302   :  { %948 = shalt.err (!%p945_p1)
}
 0x303   :  { %728 = dma.vmem_to_hbm [thread:$0]  %s723_s13, 512, %s1153_s3, [#allocation3], %s958_s9, %s958_s9, %s959_s10  }
 0x304   :  { %949 = dma.done.wait [#allocation3], 512  }
 0x305   :  { %950 = vsyncadd [#allocation3], 4294966784 }
 0x306   :  { %951 = dma.done.wait [#allocation5], 512  }
 0x307   :  { %952 = vsyncadd [#allocation5], 4294966784 }
 0x308   :  { %747 = vsyncpa [#allocation3], 1 }
 0x309   :  { %748 = vsyncpa [#allocation5], 1 }

</bundles_post_ra>
